<compile_context>
chip_gen: v6e
topology: v6e:2x2x1
jax: 0.10.0
libtpu: 0.0.40
codegen_flags: <defaults>
</compile_context>

<pallas_src>
import functools

import jax
import jax.numpy as jnp
from jax import lax
from jax.experimental import pallas as pl
from jax.experimental.pallas import tpu as pltpu

EPS = 1e-5
LANE = 128      # vreg lane width (last-dim granularity)
SUBLANE = 8     # vreg sublane width (second-to-last-dim granularity)


def _round_up(x, m):
    return (x + m - 1) // m * m


def _cdiv(a, b):
    return (a + b - 1) // b


def _device_kind():
    try:
        return jax.devices()[0].device_kind.lower()
    except Exception:
        return ""


# v5e's VPU has no bf16 ALUs -> keep the affine math in f32 there.
_IS_V5 = "v5" in _device_kind()


def _vmem_budgets():
    """(vmem_limit_bytes, per-step block budget) dispatched per generation."""
    cap = 64 * 1024 * 1024                      # conservative fallback (v7x)
    try:
        info = pltpu.get_tpu_info()
        cap = int(getattr(info, "vmem_capacity_bytes", cap))
    except Exception:
        pass
    # 128 MiB chips (v5e/v6e): limit 96 MiB, budget 64 MiB.
    # 64 MiB chips (v7x):      limit 48 MiB, budget 32 MiB.
    limit = min(cap * 3 // 4, 100 * 1024 * 1024)
    budget = limit * 2 // 3
    return limit, budget


# ---------------------------------------------------------------------------
# Single-pass kernel: a full (N, TILE_F) feature column is resident in VMEM.
# Grid is over feature tiles only ("parallel"); the reduction over N stays
# inside the block, so batch statistics are exact.
# ---------------------------------------------------------------------------
def _bn1d_fused_kernel(x_ref, gamma_ref, beta_ref, o_ref, *, eps, out_in_bf16):
    x = x_ref[...]                                            # (N, TILE_F)
    xf = x.astype(jnp.float32)
    inv_n = 1.0 / x.shape[0]
    mean = jnp.sum(xf, axis=0, keepdims=True) * inv_n          # (1, TILE_F)
    centered = xf - mean                                       # single f32 temp
    var = jnp.sum(centered * centered, axis=0, keepdims=True) * inv_n
    scale = lax.rsqrt(var + eps) * gamma_ref[...]              # (1, TILE_F) f32
    if out_in_bf16:
        # bf16 VALU output path (v6e / v7x): y = x * scale + (beta - mean*scale)
        bias = beta_ref[...] - mean * scale
        o_ref[...] = (x * scale.astype(jnp.bfloat16)
                      + bias.astype(jnp.bfloat16)).astype(o_ref.dtype)
    else:
        # Reuse `centered` for the output affine -> no second full-size temp.
        o_ref[...] = (centered * scale + beta_ref[...]).astype(o_ref.dtype)


# ---------------------------------------------------------------------------
# Two-pass path (N too large for a resident column).
# Pass 1: per-feature sum / sum-of-squares accumulated in f32 over row tiles.
#         grid = (feature tiles, N tiles); N axis last, "arbitrary"; the (1,F)
#         outputs stay VMEM-resident across the N axis (accumulator pattern).
#         Ragged N is masked in-kernel (no host-side padding of x).
# ---------------------------------------------------------------------------
def _bn1d_stats_kernel(x_ref, sum_ref, sq_ref, *, n_rows, tile_n, mask_rows):
    jn = pl.program_id(1)

    @pl.when(jn == 0)
    def _():
        sum_ref[...] = jnp.zeros_like(sum_ref)
        sq_ref[...] = jnp.zeros_like(sq_ref)

    x = x_ref[...].astype(jnp.float32)                        # (TILE_N, TILE_F)
    if mask_rows:   # static: only traced when N % TILE_N != 0
        rid = jn * tile_n + lax.broadcasted_iota(jnp.int32, x.shape, 0)
        x = jnp.where(rid < n_rows, x, 0.0)
    sum_ref[...] += jnp.sum(x, axis=0, keepdims=True)
    sq_ref[...] += jnp.sum(x * x, axis=0, keepdims=True)


# Pass 2: y = x * scale + bias with precomputed per-feature scale/bias.
def _bn1d_affine_kernel(x_ref, scale_ref, bias_ref, o_ref, *, out_in_bf16):
    x = x_ref[...]
    if out_in_bf16:
        o_ref[...] = (x * scale_ref[...].astype(jnp.bfloat16)
                      + bias_ref[...].astype(jnp.bfloat16)).astype(o_ref.dtype)
    else:
        o_ref[...] = (x.astype(jnp.float32) * scale_ref[...]
                      + bias_ref[...]).astype(o_ref.dtype)


def batchnorm1d_layernorm(x, gamma, beta, *, eps=EPS,
                          force_two_pass=False, tile_n=None):
    """BatchNorm1d (training-mode) over the flattened leading dims of x."""
    num_features = x.shape[-1]
    batch_shape = x.shape[:-1]
    x2d = x.reshape(-1, num_features)
    n_rows = x2d.shape[0]
    x_bytes = jnp.dtype(x.dtype).itemsize

    vmem_limit, vmem_budget = _vmem_budgets()
    out_in_bf16 = (x.dtype == jnp.bfloat16) and not _IS_V5

    gamma2d = gamma.astype(jnp.float32).reshape(1, num_features)
    beta2d = beta.astype(jnp.float32).reshape(1, num_features)

    ragged_f = (num_features % LANE) != 0

    def single_pass_bytes(tf):
        # 2x double-buffered input + 2x double-buffered output + 1 f32 temp.
        return n_rows * tf * (4 * x_bytes + 4) + 16 * tf * 4

    # ---- feature-tile (lane) sizing -----------------------------------------
    sp_tile_f = None
    sp_tiles = 1
    if ragged_f:
        # F not a multiple of 128: full-extent feature block (allowed because
        # block dim == full array dim) -> no host-side padding, single tile.
        tp_tile_f = num_features
        tp_tiles = 1
        if single_pass_bytes(num_features) <= vmem_budget:
            sp_tile_f = num_features
            sp_tiles = 1
    else:
        k = num_features // LANE
        divisors = [d for d in range(1, k + 1) if k % d == 0]
        target = 4 if k >= 4 else (2 if k >= 2 else 1)
        # Single-pass: widest divisor that fits the budget AND still leaves
        # >= target (else >= 2) feature tiles for pipelining / megacore.
        fitting = [d for d in divisors
                   if single_pass_bytes(LANE * d) <= vmem_budget]
        if fitting:
            pref = ([d for d in fitting if k // d >= target]
                    or [d for d in fitting if k // d >= 2]
                    or fitting)
            d = max(pref)
            sp_tile_f = LANE * d
            sp_tiles = k // d
        # Two-pass: same >= target-tiles policy (row tile sized below).
        d2 = max(d for d in divisors if k // d >= target)
        tp_tile_f = LANE * d2
        tp_tiles = k // d2

    use_single_pass = (not force_two_pass) and (sp_tile_f is not None)

    if use_single_pass:
        out2d = pl.pallas_call(
            functools.partial(_bn1d_fused_kernel, eps=eps,
                              out_in_bf16=out_in_bf16),
            out_shape=jax.ShapeDtypeStruct((n_rows, num_features), x.dtype),
            grid_spec=pltpu.PrefetchScalarGridSpec(
                num_scalar_prefetch=0,
                grid=(sp_tiles,),
                in_specs=[
                    pl.BlockSpec((n_rows, sp_tile_f), lambda jf: (0, jf)),
                    pl.BlockSpec((1, sp_tile_f), lambda jf: (0, jf)),
                    pl.BlockSpec((1, sp_tile_f), lambda jf: (0, jf)),
                ],
                out_specs=pl.BlockSpec((n_rows, sp_tile_f), lambda jf: (0, jf)),
            ),
            compiler_params=pltpu.CompilerParams(
                dimension_semantics=("parallel",),
                vmem_limit_bytes=vmem_limit),
            cost_estimate=pl.CostEstimate(
                flops=5 * n_rows * num_features,
                transcendentals=num_features,
                bytes_accessed=2 * n_rows * num_features * x_bytes
                               + 8 * num_features),
        )(x2d, gamma2d, beta2d)
        return out2d.reshape(*batch_shape, num_features)

    # ---- two-pass path -------------------------------------------------------
    # Row-tile sizing: bound VMEM use independently of N.
    per_row_bytes = tp_tile_f * (4 * x_bytes + 4)
    if tile_n is None:
        tile_n = max(SUBLANE,
                     min(vmem_budget // per_row_bytes, 2048)
                     // SUBLANE * SUBLANE)
    tile_n = max(SUBLANE, _round_up(tile_n, SUBLANE))
    tile_n = min(tile_n, _round_up(n_rows, SUBLANE))
    n_n_tiles = _cdiv(n_rows, tile_n)
    mask_rows = (n_rows % tile_n) != 0     # ragged tail handled in-kernel

    # Pass 1: per-feature sum / sum-of-squares (f32 accumulation).
    sums, sqs = pl.pallas_call(
        functools.partial(_bn1d_stats_kernel, n_rows=n_rows, tile_n=tile_n,
                          mask_rows=mask_rows),
        out_shape=(jax.ShapeDtypeStruct((1, num_features), jnp.float32),
                   jax.ShapeDtypeStruct((1, num_features), jnp.float32)),
        grid_spec=pltpu.PrefetchScalarGridSpec(
            num_scalar_prefetch=0,
            grid=(tp_tiles, n_n_tiles),
            in_specs=[pl.BlockSpec((tile_n, tp_tile_f),
                                   lambda jf, jn: (jn, jf))],
            out_specs=(pl.BlockSpec((1, tp_tile_f), lambda jf, jn: (0, jf)),
                       pl.BlockSpec((1, tp_tile_f), lambda jf, jn: (0, jf))),
        ),
        compiler_params=pltpu.CompilerParams(
            dimension_semantics=("parallel", "arbitrary"),
            vmem_limit_bytes=vmem_limit),
        cost_estimate=pl.CostEstimate(
            flops=3 * n_rows * num_features,
            transcendentals=0,
            bytes_accessed=n_rows * num_features * x_bytes
                           + 8 * num_features),
    )(x2d)

    # Tiny (1, F) math between passes: batch mean/var -> fused scale/bias.
    # TODO(synk): Welford-style chunk merging if f32 sum-of-squares is not
    # precise enough for extreme-mean data.
    inv_n = 1.0 / n_rows
    mean = sums * inv_n
    var = jnp.maximum(sqs * inv_n - mean * mean, 0.0)
    scale = lax.rsqrt(var + eps) * gamma2d
    bias = beta2d - mean * scale

    # Pass 2: normalize, fully parallel grid. Boundary-block writes past N are
    # dropped by Pallas, so no output slicing is needed.
    out2d = pl.pallas_call(
        functools.partial(_bn1d_affine_kernel, out_in_bf16=out_in_bf16),
        out_shape=jax.ShapeDtypeStruct((n_rows, num_features), x.dtype),
        grid_spec=pltpu.PrefetchScalarGridSpec(
            num_scalar_prefetch=0,
            grid=(tp_tiles, n_n_tiles),
            in_specs=[
                pl.BlockSpec((tile_n, tp_tile_f), lambda jf, jn: (jn, jf)),
                pl.BlockSpec((1, tp_tile_f), lambda jf, jn: (0, jf)),
                pl.BlockSpec((1, tp_tile_f), lambda jf, jn: (0, jf)),
            ],
            out_specs=pl.BlockSpec((tile_n, tp_tile_f),
                                   lambda jf, jn: (jn, jf)),
        ),
        compiler_params=pltpu.CompilerParams(
            dimension_semantics=("parallel", "parallel"),
            vmem_limit_bytes=vmem_limit),
        cost_estimate=pl.CostEstimate(
            flops=2 * n_rows * num_features,
            transcendentals=0,
            bytes_accessed=2 * n_rows * num_features * x_bytes
                           + 8 * num_features),
    )(x2d, scale, bias)

    # TODO(synk): running_mean/running_var momentum update (inference buffers)
    # is kept outside the kernel; training-mode forward output does not use it.
    return out2d.reshape(*batch_shape, num_features)


if __name__ == "__main__":
    key = jax.random.PRNGKey(0)
    k1, k2, k3 = jax.random.split(key, 3)

    def reference(x, gamma, beta):
        F = x.shape[-1]
        x2d = x.reshape(-1, F).astype(jnp.float32)
        mean = x2d.mean(axis=0, keepdims=True)
        var = ((x2d - mean) ** 2).mean(axis=0, keepdims=True)
        y = (x2d - mean) / jnp.sqrt(var + EPS) * gamma + beta
        return y.reshape(x.shape).astype(x.dtype)

    # torch.nn.BatchNorm1d default parameters (weight=1, bias=0).
    F1 = 32
    gamma1 = jnp.ones((F1,), dtype=jnp.float32)
    beta1 = jnp.zeros((F1,), dtype=jnp.float32)

    # Case 1: module-like shape (batch=2, seq=8, hidden=32 -> N=16 rows);
    # ragged F (<128) handled with a full-extent feature block, no padding.
    x1 = jax.random.normal(k1, (2, 8, F1), dtype=jnp.float32)
    out1 = jax.block_until_ready(batchnorm1d_layernorm(x1, gamma1, beta1))
    ref1 = reference(x1, gamma1, beta1)
    assert out1.shape == x1.shape and out1.dtype == x1.dtype
    assert jnp.allclose(out1, ref1, atol=1e-5, rtol=1e-5), "single-pass mismatch"

    # Case 2: F = 256 (lane-dense) -> >= 2 feature tiles, pipelined single pass.
    F2 = 256
    gamma2 = 1.0 + 0.1 * jax.random.normal(k2, (F2,), dtype=jnp.float32)
    beta2 = 0.1 * jax.random.normal(k3, (F2,), dtype=jnp.float32)
    x2 = jax.random.normal(k1, (4, 8, F2), dtype=jnp.float32)
    out2 = jax.block_until_ready(batchnorm1d_layernorm(x2, gamma2, beta2))
    ref2 = reference(x2, gamma2, beta2)
    assert jnp.allclose(out2, ref2, atol=1e-5, rtol=1e-5), "tiled single-pass mismatch"

    # Case 3: force the two-pass (large-N) structure with a ragged row count
    # (N = 18, tile_n = 8) to exercise masked stats accumulation + affine pass.
    x3 = jax.random.normal(k2, (2, 9, F1), dtype=jnp.float32)
    out3 = jax.block_until_ready(
        batchnorm1d_layernorm(x3, gamma1, beta1, force_two_pass=True, tile_n=8))
    ref3 = reference(x3, gamma1, beta1)
    assert jnp.allclose(out3, ref3, atol=1e-4, rtol=1e-4), "two-pass mismatch"

    print("KERNEL_OK")
</pallas_src>

<mosaic_0001>
module attributes {stable_mosaic.version = 11 : i64} {
  func.func @_bn1d_fused_kernel(%arg0: i32, %arg1: memref<16x32xf32, #tpu.memory_space<vmem>>, %arg2: memref<1x32xf32, #tpu.memory_space<vmem>>, %arg3: memref<1x32xf32, #tpu.memory_space<vmem>>, %arg4: memref<16x32xf32, #tpu.memory_space<vmem>>) attributes {dimension_semantics = [#tpu.dimension_semantics<parallel>], iteration_bounds = array<i64: 1>, scalar_prefetch = 0 : i64, scratch_operands = 0 : i64, tpu.core_type = #tpu.core_type<tc>, window_params = [{transform_indices = @transform_0, window_bounds = array<i64: 16, 32>}, {transform_indices = @transform_1, window_bounds = array<i64: 1, 32>}, {transform_indices = @transform_2, window_bounds = array<i64: 1, 32>}, {transform_indices = @transform_3, window_bounds = array<i64: 16, 32>}]} {
    %c0 = arith.constant 0 : index
    %c0_0 = arith.constant 0 : index
    %0 = vector.load %arg1[%c0, %c0_0] : memref<16x32xf32, #tpu.memory_space<vmem>>, vector<16x32xf32>
    %cst = arith.constant dense<0.000000e+00> : vector<32xf32>
    %1 = vector.multi_reduction <add>, %0, %cst [0] : vector<16x32xf32> to vector<32xf32>
    %2 = vector.shape_cast %1 : vector<32xf32> to vector<1x32xf32>
    %cst_1 = arith.constant 6.250000e-02 : f32
    %3 = vector.broadcast %cst_1 : f32 to vector<1x32xf32>
    %4 = arith.mulf %2, %3 : vector<1x32xf32>
    %5 = vector.broadcast %4 : vector<1x32xf32> to vector<16x32xf32>
    %6 = arith.subf %0, %5 : vector<16x32xf32>
    %7 = arith.mulf %6, %6 : vector<16x32xf32>
    %cst_2 = arith.constant dense<0.000000e+00> : vector<32xf32>
    %8 = vector.multi_reduction <add>, %7, %cst_2 [0] : vector<16x32xf32> to vector<32xf32>
    %9 = vector.shape_cast %8 : vector<32xf32> to vector<1x32xf32>
    %cst_3 = arith.constant 6.250000e-02 : f32
    %10 = vector.broadcast %cst_3 : f32 to vector<1x32xf32>
    %11 = arith.mulf %9, %10 : vector<1x32xf32>
    %cst_4 = arith.constant 9.99999974E-6 : f32
    %12 = vector.broadcast %cst_4 : f32 to vector<1x32xf32>
    %13 = arith.addf %11, %12 : vector<1x32xf32>
    %14 = math.rsqrt %13 : vector<1x32xf32>
    %c0_5 = arith.constant 0 : index
    %c0_6 = arith.constant 0 : index
    %15 = vector.load %arg2[%c0_5, %c0_6] : memref<1x32xf32, #tpu.memory_space<vmem>>, vector<1x32xf32>
    %16 = arith.mulf %14, %15 : vector<1x32xf32>
    %17 = vector.broadcast %16 : vector<1x32xf32> to vector<16x32xf32>
    %18 = arith.mulf %6, %17 : vector<16x32xf32>
    %c0_7 = arith.constant 0 : index
    %c0_8 = arith.constant 0 : index
    %19 = vector.load %arg3[%c0_7, %c0_8] : memref<1x32xf32, #tpu.memory_space<vmem>>, vector<1x32xf32>
    %20 = vector.broadcast %19 : vector<1x32xf32> to vector<16x32xf32>
    %21 = arith.addf %18, %20 : vector<16x32xf32>
    %c0_9 = arith.constant 0 : index
    %c0_10 = arith.constant 0 : index
    %22 = vector.load %arg4[%c0_9, %c0_10] : memref<16x32xf32, #tpu.memory_space<vmem>>, vector<16x32xf32>
    tpu.vector_store %arg4[%c0_9, %c0_10], %21 {strides = array<i32>} : memref<16x32xf32, #tpu.memory_space<vmem>>, vector<16x32xf32>,
    return
  }
  func.func @transform_0(%arg0: i32) -> (i32, i32) {
    %c0_i32 = arith.constant 0 : i32
    %c0_i32_0 = arith.constant 0 : i32
    return %c0_i32, %arg0 : i32, i32
  }
  func.func @transform_1(%arg0: i32) -> (i32, i32) {
    %c0_i32 = arith.constant 0 : i32
    %c0_i32_0 = arith.constant 0 : i32
    return %c0_i32, %arg0 : i32, i32
  }
  func.func @transform_2(%arg0: i32) -> (i32, i32) {
    %c0_i32 = arith.constant 0 : i32
    %c0_i32_0 = arith.constant 0 : i32
    return %c0_i32, %arg0 : i32, i32
  }
  func.func @transform_3(%arg0: i32) -> (i32, i32) {
    %c0_i32 = arith.constant 0 : i32
    %c0_i32_0 = arith.constant 0 : i32
    return %c0_i32, %arg0 : i32, i32
  }
}

</mosaic_0001>

<bundles_post_ra>
// kernel: tpu_custom_call.1
= control target key start
LH: loop header
LB: loop body
LE: loop exit
PB: predicated region body
PF: predicated region fallthrough
CT: control target
= control target key end

     0   :  { %8 = vsyncpa [#allocation3], 0  ;;  %s193_s0 = inlined_call_operand.hbm [shape: f32[16,32], index: 0, kind: input, shape index: {}]   ;;  %s194_s1 = inlined_call_operand.vmem [shape: f32[1,32], index: 1, kind: input, shape index: {}]   ;;  %s195_s2 = inlined_call_operand.vmem [shape: f32[1,32], index: 2, kind: input, shape index: {}]   ;;  %s196_s3 = inlined_call_operand.hbm [shape: f32[16,32], index: 3, kind: output, shape index: {}]  }
   0x1   :  { %9 = vsyncpa [#allocation4], 0  ;;  %s145_s12 = smov [#allocation2]  }
   0x2   :  { %s15_s13 = sshll.u32 %s145_s12, 4  ;;  %s16_s13 = int_to_ptr.vmem [resolvable:$true] %s15_s13 }
   0x3   :  { %s109_s14 = scalar_lea.vmem %s16_s13, 256  ;;  %p114_p1 = scmp.lt.s32.totalorder %s16_s13, %s16_s13 }
   0x4   :  { %p110_p0 = scmp.ne.s32.totalorder %s16_s13, %s109_s14  ;;  %p115_p2 = scmp.lt.s32.totalorder %s109_s14, %s109_s14 }
   0x6   :  { %p116_p3 = por %p115_p2, %p114_p1 }
   0x8   :  { %p117_p4 = pnand %p116_p3, %p110_p0 }
   0xa   :  { %120 = shalt.err (!%p117_p4)
}
   0xb   :  { %s146_s15 = smov 128   ;;  %s147_s16 = smov 8  }
   0xc   :  { %21 = dma.hbm_to_vmem [thread:$0]  %s193_s0, 256, %s16_s13, [#allocation3], %s146_s15, %s146_s15, %s147_s16  }
   0xd   :  { %141 = dma.done.wait [#allocation3], 256  }
   0xe   :  { %142 = vsyncadd [#allocation3], 4294967040  ;;  %vm31_vm0 = vcmask 261120   ;;  %v29_v0 = vld [vmem:[#allocation2] sm:$0xff]  ;;  %v30_v1 = vld [vmem:[#allocation2 + $0x8] sm:$0xff]  ;;  %v60_v27 = vlaneseq  ;;  %s148_s22 = smov [#allocation5]  }
   0xf   :  { %v32_v2 = vsel %vm31_vm0, %v29_v0, 0.0  ;;  %v33_v3 = vsel %vm31_vm0, %v30_v1, 0.0  ;;  %v58_v29 = vld [vmem:[%s194_s1] sm:$0x1]  ;;  %s82_s23 = sshll.u32 %s148_s22, 4  ;;  %s83_s23 = int_to_ptr.vmem [resolvable:$true] %s82_s23 }
  0x10   :  { %v34_v4 = vadd.f32 %v33_v3, %v32_v2  ;;  %v61_v28 = vshrl.u32 %v60_v27, 7  ;;  %v94_v34 = vld [vmem:[%s195_s2] ss:$0 sm:$0xff]  ;;  %s121_s1 = scalar_lea.vmem %s83_s23, 256  ;;  %p126_p6 = scmp.lt.s32.totalorder %s83_s23, %s83_s23 }
  0x11   :  { %p122_p5 = scmp.ne.s32.totalorder %s83_s23, %s121_s1  ;;  %p127_p7 = scmp.lt.s32.totalorder %s121_s1, %s121_s1 }
  0x12   :  { %v35_v5 = vrot.slane %v34_v4, 4  ;;  %v62_v30 = vsub.s32 0, %v61_v28 }
  0x13   :  { %p128_p8 = por %p127_p7, %p126_p6 }
  0x14   :  { %v36_v6 = vadd.f32 %v35_v5, %v34_v4 }
  0x15   :  { %p129_p9 = pnand %p128_p8, %p122_p5 }
  0x16   :  { %v37_v7 = vrot.slane %v36_v6, 2 }
  0x18   :  { %v38_v8 = vadd.f32 %v37_v7, %v36_v6 }
  0x1a   :  { %v39_v9 = vrot.slane %v38_v8, 1 }
  0x1c   :  { %v40_v10 = vadd.f32 %v39_v9, %v38_v8 }
  0x1e   :  { %v41_v11 = vmul.f32 0.0625, %v40_v10 }
  0x20   :  { %v42_v12 = vsub.f32 %v29_v0, %v41_v11  ;;  %v43_v13 = vsub.f32 %v30_v1, %v41_v11 }
  0x22   :  { %v44_v14 = vmul.f32 %v42_v12, %v42_v12  ;;  %v45_v15 = vmul.f32 %v43_v13, %v43_v13 }
  0x24   :  { %v46_v16 = vsel %vm31_vm0, %v44_v14, 0.0  ;;  %v47_v17 = vsel %vm31_vm0, %v45_v15, 0.0 }
  0x25   :  { %v48_v18 = vadd.f32 %v47_v17, %v46_v16 }
  0x27   :  { %v49_v19 = vrot.slane %v48_v18, 4 }
  0x29   :  { %v50_v20 = vadd.f32 %v49_v19, %v48_v18 }
  0x2b   :  { %v51_v21 = vrot.slane %v50_v20, 2 }
  0x2d   :  { %v52_v22 = vadd.f32 %v51_v21, %v50_v20 }
  0x2f   :  { %v53_v23 = vrot.slane %v52_v22, 1 }
  0x31   :  { %v54_v24 = vadd.f32 %v53_v23, %v52_v22 }
  0x33   :  { %v55_v25 = vmul.f32 0.0625, %v54_v24 }
  0x35   :  { %v56_v26 = vadd.f32 1e-05, %v55_v25 }
  0x37   :  { %99 = vrsqrt.f32 %v56_v26 }
  0x44   :  { %v100_v31 = vpop.eup %99 }
  0x45   :  { %v59_v32 = vmul.f32 %v100_v31, %v58_v29 }
  0x47   :  { %v63_v33 = vrot.slane %v59_v32, %v62_v30 }
  0x49   :  { %v64_v35 = vmul.f32 %v63_v33, %v42_v12  ;;  %v65_v36 = vmul.f32 %v63_v33, %v43_v13 }
  0x4b   :  { %v73_v37 = vadd.f32 %v94_v34, %v64_v35  ;;  %v74_v38 = vadd.f32 %v94_v34, %v65_v36 }
  0x4d   :  { %75 = vst.msk [vmem:[#allocation5] sm:$0xff] %vm31_vm0, %v73_v37  ;;  %76 = vst.msk [vmem:[#allocation5 + $0x8] sm:$0xff] %vm31_vm0, %v74_v38 }
  0x4e   :  { %132 = shalt.err (!%p129_p9)
}
  0x4f   :  { %88 = dma.vmem_to_hbm [thread:$0]  %s83_s23, 256, %s196_s3, [#allocation4], %s146_s15, %s146_s15, %s147_s16  }
  0x50   :  { %143 = dma.done.wait [#allocation4], 256  }
  0x51   :  { %144 = vsyncadd [#allocation4], 4294967040 }
  0x52   :  { %92 = vsyncpa [#allocation3], 1 }
  0x53   :  { %93 = vsyncpa [#allocation4], 1 }

</bundles_post_ra>
